<compile_context>
chip_gen: v6e
topology: v6e:2x2x1
jax: 0.10.0
libtpu: 0.0.40
codegen_flags: <defaults>
</compile_context>

<pallas_src>
import math
from functools import partial

import jax
import jax.numpy as jnp
from jax.experimental import pallas as pl
from jax.experimental.pallas import tpu as pltpu


# ----------------------------------------------------------------------------
# Fused AttentionPool2d kernel: one grid step = one batch element.
#   x_ref    : (1, HW, C)   spatial tokens, channels-last
#   pos0_ref : (1, C)       positional embedding of the mean token
#   posr_ref : (HW, C)      positional embedding of the spatial tokens
#   wqkv_ref : (C, 3C)      qkv_proj weight (transposed 1x1 conv)
#   bqkv_ref : (1, 3C)
#   wc_ref   : (C, out_dim) c_proj weight (transposed 1x1 conv)
#   bc_ref   : (1, out_dim)
#   o_ref    : (1, 1, out_dim)
# ----------------------------------------------------------------------------
def _attnpool_kernel(x_ref, pos0_ref, posr_ref, wqkv_ref, bqkv_ref, wc_ref,
                     bc_ref, o_ref, *, num_heads, head_ch):
    C = num_heads * head_ch
    x = x_ref[0].astype(jnp.float32)                           # (HW, C)
    hw = x.shape[0]

    # mean token (token 0 of the sequence), then add positional embeddings
    mean_tok = jnp.sum(x, axis=0, keepdims=True) * (1.0 / hw)  # (1, C)
    cls_tok = mean_tok + pos0_ref[...]                         # (1, C)
    spa_tok = x + posr_ref[...]                                # (HW, C)

    # qkv projection (1x1 conv == matmul), MXU with f32 accumulation
    wqkv = wqkv_ref[...]
    bqkv = bqkv_ref[...]
    qkv_cls = jnp.dot(cls_tok, wqkv,
                      preferred_element_type=jnp.float32) + bqkv    # (1, 3C)
    qkv_spa = jnp.dot(spa_tok, wqkv,
                      preferred_element_type=jnp.float32) + bqkv    # (HW, 3C)

    # combined q*k scale: (1/ch^0.25)^2 = 1/sqrt(ch), applied once to q
    scale = 1.0 / math.sqrt(float(head_ch))

    head_outs = []
    for h in range(num_heads):
        lo = h * head_ch
        hi = lo + head_ch
        q_h = qkv_cls[:, lo:hi] * scale                        # (1, ch)  query = mean token only
        kc_h = qkv_cls[:, C + lo:C + hi]                       # (1, ch)
        ks_h = qkv_spa[:, C + lo:C + hi]                       # (HW, ch)
        vc_h = qkv_cls[:, 2 * C + lo:2 * C + hi]               # (1, ch)
        vs_h = qkv_spa[:, 2 * C + lo:2 * C + hi]               # (HW, ch)

        # attention logits of the mean-token query against [cls, spatial...] keys
        l_cls = jnp.sum(q_h * kc_h, axis=-1, keepdims=True)    # (1, 1)
        l_spa = jnp.sum(q_h * ks_h, axis=-1, keepdims=True)    # (HW, 1)

        # numerically stable softmax over the (1 + HW) keys
        m = jnp.maximum(jnp.max(l_spa, axis=0, keepdims=True), l_cls)   # (1, 1)
        p_cls = jnp.exp(l_cls - m)                              # (1, 1)
        p_spa = jnp.exp(l_spa - m)                              # (HW, 1)
        denom = p_cls + jnp.sum(p_spa, axis=0, keepdims=True)   # (1, 1)

        num = p_cls * vc_h + jnp.sum(p_spa * vs_h, axis=0, keepdims=True)  # (1, ch)
        head_outs.append(num / denom)

    a = jnp.concatenate(head_outs, axis=-1)                     # (1, C)
    out = jnp.dot(a, wc_ref[...],
                  preferred_element_type=jnp.float32) + bc_ref[...]       # (1, out_dim)
    o_ref[0] = out.astype(o_ref.dtype)


def attention_pool_2d(x_nchw, params, *, num_heads):
    """AttentionPool2d forward. x_nchw: (B, C, H, W) -> (B, out_dim)."""
    B, C, H, W = x_nchw.shape
    HW = H * W
    head_ch = C // num_heads
    out_dim = params["w_c"].shape[0]

    # layout plumbing (free reshapes/transposes in the XLA wrapper)
    x = jnp.transpose(x_nchw.reshape(B, C, HW), (0, 2, 1))      # (B, HW, C) channels-last
    pos = params["pos"]                                          # (C, HW+1), torch layout
    pos0 = pos[:, 0].reshape(1, C)                               # mean-token pos emb
    posr = jnp.transpose(pos[:, 1:], (1, 0))                     # (HW, C)
    w_qkv = jnp.transpose(params["w_qkv"].reshape(3 * C, C), (1, 0))   # (C, 3C)
    b_qkv = params["b_qkv"].reshape(1, 3 * C)
    w_c = jnp.transpose(params["w_c"].reshape(out_dim, C), (1, 0))     # (C, out_dim)
    b_c = params["b_c"].reshape(1, out_dim)

    kernel = partial(_attnpool_kernel, num_heads=num_heads, head_ch=head_ch)
    out3 = pl.pallas_call(
        kernel,
        out_shape=jax.ShapeDtypeStruct((B, 1, out_dim), x_nchw.dtype),
        grid=(B,),
        in_specs=[
            pl.BlockSpec((1, HW, C), lambda b: (b, 0, 0)),
            pl.BlockSpec((1, C), lambda b: (0, 0)),
            pl.BlockSpec((HW, C), lambda b: (0, 0)),
            pl.BlockSpec((C, 3 * C), lambda b: (0, 0)),
            pl.BlockSpec((1, 3 * C), lambda b: (0, 0)),
            pl.BlockSpec((C, out_dim), lambda b: (0, 0)),
            pl.BlockSpec((1, out_dim), lambda b: (0, 0)),
        ],
        out_specs=pl.BlockSpec((1, 1, out_dim), lambda b: (b, 0, 0)),
        compiler_params=pltpu.CompilerParams(
            dimension_semantics=("parallel",)),   # v7x: one batch element per TC
    )(x, pos0, posr, w_qkv, b_qkv, w_c, b_c)
    return out3.reshape(B, out_dim)


# ----------------------------------------------------------------------------
# Pure-JAX reference that mirrors the PyTorch forward exactly (full attention,
# then slice token 0), used for validation.
# ----------------------------------------------------------------------------
def ref_forward(x_nchw, params, *, num_heads):
    B, C, H, W = x_nchw.shape
    x = x_nchw.reshape(B, C, H * W)
    x = jnp.concatenate([x.mean(axis=-1, keepdims=True), x], axis=-1)   # (B, C, T)
    x = x + params["pos"][None, :, :]

    w_qkv = params["w_qkv"][..., 0]                                      # (3C, C)
    qkv = jnp.einsum("oc,bct->bot", w_qkv, x) + params["b_qkv"][None, :, None]

    bs, width, length = qkv.shape
    ch = width // (3 * num_heads)
    q, k, v = jnp.split(qkv, 3, axis=1)
    scale = 1.0 / math.sqrt(math.sqrt(ch))
    q = (q * scale).reshape(bs * num_heads, ch, length)
    k = (k * scale).reshape(bs * num_heads, ch, length)
    v = v.reshape(bs * num_heads, ch, length)
    weight = jnp.einsum("bct,bcs->bts", q, k)
    weight = jax.nn.softmax(weight.astype(jnp.float32), axis=-1)
    a = jnp.einsum("bts,bcs->bct", weight, v).reshape(bs, -1, length)    # (B, C, T)

    w_c = params["w_c"][..., 0]                                          # (out, C)
    out = jnp.einsum("oc,bct->bot", w_c, a) + params["b_c"][None, :, None]
    return out[:, :, 0]


# ----------------------------------------------------------------------------
if __name__ == "__main__":
    B = 2
    SPACIAL = 8                     # spacial_dim -> 8x8 = 64 spatial tokens (+1 mean)
    C = 128                         # embed_dim (lane-dense)
    HEAD_CH = 64                    # num_heads_channels -> num_heads = 2
    NUM_HEADS = C // HEAD_CH
    OUT = C                         # output_dim=None -> embed_dim
    T = SPACIAL * SPACIAL + 1

    key = jax.random.PRNGKey(0)
    ks = jax.random.split(key, 6)
    params = {
        "pos":   jax.random.normal(ks[0], (C, T), jnp.float32) / C ** 0.5,
        "w_qkv": 0.05 * jax.random.normal(ks[1], (3 * C, C, 1), jnp.float32),
        "b_qkv": 0.05 * jax.random.normal(ks[2], (3 * C,), jnp.float32),
        "w_c":   0.05 * jax.random.normal(ks[3], (OUT, C, 1), jnp.float32),
        "b_c":   0.05 * jax.random.normal(ks[4], (OUT,), jnp.float32),
    }
    x = jax.random.normal(ks[5], (B, C, SPACIAL, SPACIAL), jnp.float32)

    fwd = jax.jit(partial(attention_pool_2d, num_heads=NUM_HEADS))
    out = jax.block_until_ready(fwd(x, params))
    assert out.shape == (B, OUT), out.shape

    ref = jax.block_until_ready(ref_forward(x, params, num_heads=NUM_HEADS))
    err = jnp.max(jnp.abs(out - ref))
    assert err < 1e-3, f"max abs error {err}"

    print("KERNEL_OK")
</pallas_src>

<mosaic_0001>
module attributes {stable_mosaic.version = 11 : i64} {
  func.func @_attnpool_kernel(%arg0: i32, %arg1: memref<1x64x128xf32, #tpu.memory_space<vmem>>, %arg2: memref<1x128xf32, #tpu.memory_space<vmem>>, %arg3: memref<64x128xf32, #tpu.memory_space<vmem>>, %arg4: memref<128x384xf32, #tpu.memory_space<vmem>>, %arg5: memref<1x384xf32, #tpu.memory_space<vmem>>, %arg6: memref<128x128xf32, #tpu.memory_space<vmem>>, %arg7: memref<1x128xf32, #tpu.memory_space<vmem>>, %arg8: memref<1x1x128xf32, #tpu.memory_space<vmem>>) attributes {dimension_semantics = [#tpu.dimension_semantics<parallel>], iteration_bounds = array<i64: 2>, scalar_prefetch = 0 : i64, scratch_operands = 0 : i64, tpu.core_type = #tpu.core_type<tc>, window_params = [{transform_indices = @transform_0, window_bounds = array<i64: 1, 64, 128>}, {pipeline_mode = #tpu.pipeline_mode<synchronous>, transform_indices = @transform_1, window_bounds = array<i64: 1, 128>}, {pipeline_mode = #tpu.pipeline_mode<synchronous>, transform_indices = @transform_2, window_bounds = array<i64: 64, 128>}, {pipeline_mode = #tpu.pipeline_mode<synchronous>, transform_indices = @transform_3, window_bounds = array<i64: 128, 384>}, {pipeline_mode = #tpu.pipeline_mode<synchronous>, transform_indices = @transform_4, window_bounds = array<i64: 1, 384>}, {pipeline_mode = #tpu.pipeline_mode<synchronous>, transform_indices = @transform_5, window_bounds = array<i64: 128, 128>}, {pipeline_mode = #tpu.pipeline_mode<synchronous>, transform_indices = @transform_6, window_bounds = array<i64: 1, 128>}, {transform_indices = @transform_7, window_bounds = array<i64: 1, 1, 128>}]} {
    %c0 = arith.constant 0 : index
    %c0_0 = arith.constant 0 : index
    %c0_1 = arith.constant 0 : index
    %0 = vector.load %arg1[%c0, %c0_0, %c0_1] : memref<1x64x128xf32, #tpu.memory_space<vmem>>, vector<1x64x128xf32>
    %1 = vector.shape_cast %0 : vector<1x64x128xf32> to vector<64x128xf32>
    %cst = arith.constant dense<0.000000e+00> : vector<128xf32>
    %2 = vector.multi_reduction <add>, %1, %cst [0] : vector<64x128xf32> to vector<128xf32>
    %3 = vector.shape_cast %2 : vector<128xf32> to vector<1x128xf32>
    %cst_2 = arith.constant 1.562500e-02 : f32
    %4 = vector.broadcast %cst_2 : f32 to vector<1x128xf32>
    %5 = arith.mulf %3, %4 : vector<1x128xf32>
    %c0_3 = arith.constant 0 : index
    %c0_4 = arith.constant 0 : index
    %6 = vector.load %arg2[%c0_3, %c0_4] : memref<1x128xf32, #tpu.memory_space<vmem>>, vector<1x128xf32>
    %7 = arith.addf %5, %6 : vector<1x128xf32>
    %c0_5 = arith.constant 0 : index
    %c0_6 = arith.constant 0 : index
    %8 = vector.load %arg3[%c0_5, %c0_6] : memref<64x128xf32, #tpu.memory_space<vmem>>, vector<64x128xf32>
    %9 = arith.addf %1, %8 : vector<64x128xf32>
    %c0_7 = arith.constant 0 : index
    %c0_8 = arith.constant 0 : index
    %10 = vector.load %arg4[%c0_7, %c0_8] : memref<128x384xf32, #tpu.memory_space<vmem>>, vector<128x384xf32>
    %c0_9 = arith.constant 0 : index
    %c0_10 = arith.constant 0 : index
    %11 = vector.load %arg5[%c0_9, %c0_10] : memref<1x384xf32, #tpu.memory_space<vmem>>, vector<1x384xf32>
    %cst_11 = arith.constant dense<0.000000e+00> : vector<1x384xf32>
    %12 = tpu.matmul %7, %10, %cst_11 {dimension_numbers = #tpu.dot_dimension_numbers<[1], [0], [0], [1], [0, 0, 1, 1], [], []>} : vector<1x128xf32>, vector<128x384xf32>, vector<1x384xf32> -> vector<1x384xf32>
    %13 = arith.addf %12, %11 : vector<1x384xf32>
    %cst_12 = arith.constant dense<0.000000e+00> : vector<64x384xf32>
    %14 = tpu.matmul %9, %10, %cst_12 {dimension_numbers = #tpu.dot_dimension_numbers<[1], [0], [0], [1], [0, 0, 1, 1], [], []>} : vector<64x128xf32>, vector<128x384xf32>, vector<64x384xf32> -> vector<64x384xf32>
    %15 = vector.broadcast %11 : vector<1x384xf32> to vector<64x384xf32>
    %16 = arith.addf %14, %15 : vector<64x384xf32>
    %17 = vector.extract_strided_slice %13 {offsets = [0, 0], sizes = [1, 64], strides = [1, 1]} : vector<1x384xf32> to vector<1x64xf32>
    %cst_13 = arith.constant 1.250000e-01 : f32
    %18 = vector.broadcast %cst_13 : f32 to vector<1x64xf32>
    %19 = arith.mulf %17, %18 : vector<1x64xf32>
    %20 = vector.extract_strided_slice %13 {offsets = [0, 128], sizes = [1, 64], strides = [1, 1]} : vector<1x384xf32> to vector<1x64xf32>
    %21 = vector.extract_strided_slice %16 {offsets = [0, 128], sizes = [64, 64], strides = [1, 1]} : vector<64x384xf32> to vector<64x64xf32>
    %22 = vector.extract_strided_slice %13 {offsets = [0, 256], sizes = [1, 64], strides = [1, 1]} : vector<1x384xf32> to vector<1x64xf32>
    %23 = vector.extract_strided_slice %16 {offsets = [0, 256], sizes = [64, 64], strides = [1, 1]} : vector<64x384xf32> to vector<64x64xf32>
    %24 = arith.mulf %19, %20 : vector<1x64xf32>
    %cst_14 = arith.constant dense<0.000000e+00> : vector<1xf32>
    %25 = vector.multi_reduction <add>, %24, %cst_14 [1] : vector<1x64xf32> to vector<1xf32>
    %26 = vector.shape_cast %25 : vector<1xf32> to vector<1x1xf32>
    %27 = vector.broadcast %19 : vector<1x64xf32> to vector<64x64xf32>
    %28 = arith.mulf %27, %21 : vector<64x64xf32>
    %cst_15 = arith.constant dense<0.000000e+00> : vector<64xf32>
    %29 = vector.multi_reduction <add>, %28, %cst_15 [1] : vector<64x64xf32> to vector<64xf32>
    %30 = vector.shape_cast %29 : vector<64xf32> to vector<64x1xf32>
    %cst_16 = arith.constant dense<0xFF800000> : vector<1xf32>
    %31 = vector.multi_reduction <maximumf>, %30, %cst_16 [0] : vector<64x1xf32> to vector<1xf32>
    %32 = vector.shape_cast %31 : vector<1xf32> to vector<1x1xf32>
    %33 = arith.maximumf %32, %26 : vector<1x1xf32>
    %34 = arith.subf %26, %33 : vector<1x1xf32>
    %35 = math.exp %34 : vector<1x1xf32>
    %36 = vector.broadcast %33 : vector<1x1xf32> to vector<64x1xf32>
    %37 = arith.subf %30, %36 : vector<64x1xf32>
    %38 = math.exp %37 : vector<64x1xf32>
    %cst_17 = arith.constant dense<0.000000e+00> : vector<1xf32>
    %39 = vector.multi_reduction <add>, %38, %cst_17 [0] : vector<64x1xf32> to vector<1xf32>
    %40 = vector.shape_cast %39 : vector<1xf32> to vector<1x1xf32>
    %41 = arith.addf %35, %40 : vector<1x1xf32>
    %42 = vector.broadcast %35 : vector<1x1xf32> to vector<1x64xf32>
    %43 = arith.mulf %42, %22 : vector<1x64xf32>
    %44 = vector.broadcast %38 : vector<64x1xf32> to vector<64x64xf32>
    %45 = arith.mulf %44, %23 : vector<64x64xf32>
    %cst_18 = arith.constant dense<0.000000e+00> : vector<64xf32>
    %46 = vector.multi_reduction <add>, %45, %cst_18 [0] : vector<64x64xf32> to vector<64xf32>
    %47 = vector.shape_cast %46 : vector<64xf32> to vector<1x64xf32>
    %48 = arith.addf %43, %47 : vector<1x64xf32>
    %49 = vector.broadcast %41 : vector<1x1xf32> to vector<1x64xf32>
    %50 = arith.divf %48, %49 : vector<1x64xf32>
    %51 = vector.extract_strided_slice %13 {offsets = [0, 64], sizes = [1, 64], strides = [1, 1]} : vector<1x384xf32> to vector<1x64xf32>
    %cst_19 = arith.constant 1.250000e-01 : f32
    %52 = vector.broadcast %cst_19 : f32 to vector<1x64xf32>
    %53 = arith.mulf %51, %52 : vector<1x64xf32>
    %54 = vector.extract_strided_slice %13 {offsets = [0, 192], sizes = [1, 64], strides = [1, 1]} : vector<1x384xf32> to vector<1x64xf32>
    %55 = vector.extract_strided_slice %16 {offsets = [0, 192], sizes = [64, 64], strides = [1, 1]} : vector<64x384xf32> to vector<64x64xf32>
    %56 = vector.extract_strided_slice %13 {offsets = [0, 320], sizes = [1, 64], strides = [1, 1]} : vector<1x384xf32> to vector<1x64xf32>
    %57 = vector.extract_strided_slice %16 {offsets = [0, 320], sizes = [64, 64], strides = [1, 1]} : vector<64x384xf32> to vector<64x64xf32>
    %58 = arith.mulf %53, %54 : vector<1x64xf32>
    %cst_20 = arith.constant dense<0.000000e+00> : vector<1xf32>
    %59 = vector.multi_reduction <add>, %58, %cst_20 [1] : vector<1x64xf32> to vector<1xf32>
    %60 = vector.shape_cast %59 : vector<1xf32> to vector<1x1xf32>
    %61 = vector.broadcast %53 : vector<1x64xf32> to vector<64x64xf32>
    %62 = arith.mulf %61, %55 : vector<64x64xf32>
    %cst_21 = arith.constant dense<0.000000e+00> : vector<64xf32>
    %63 = vector.multi_reduction <add>, %62, %cst_21 [1] : vector<64x64xf32> to vector<64xf32>
    %64 = vector.shape_cast %63 : vector<64xf32> to vector<64x1xf32>
    %cst_22 = arith.constant dense<0xFF800000> : vector<1xf32>
    %65 = vector.multi_reduction <maximumf>, %64, %cst_22 [0] : vector<64x1xf32> to vector<1xf32>
    %66 = vector.shape_cast %65 : vector<1xf32> to vector<1x1xf32>
    %67 = arith.maximumf %66, %60 : vector<1x1xf32>
    %68 = arith.subf %60, %67 : vector<1x1xf32>
    %69 = math.exp %68 : vector<1x1xf32>
    %70 = vector.broadcast %67 : vector<1x1xf32> to vector<64x1xf32>
    %71 = arith.subf %64, %70 : vector<64x1xf32>
    %72 = math.exp %71 : vector<64x1xf32>
    %cst_23 = arith.constant dense<0.000000e+00> : vector<1xf32>
    %73 = vector.multi_reduction <add>, %72, %cst_23 [0] : vector<64x1xf32> to vector<1xf32>
    %74 = vector.shape_cast %73 : vector<1xf32> to vector<1x1xf32>
    %75 = arith.addf %69, %74 : vector<1x1xf32>
    %76 = vector.broadcast %69 : vector<1x1xf32> to vector<1x64xf32>
    %77 = arith.mulf %76, %56 : vector<1x64xf32>
    %78 = vector.broadcast %72 : vector<64x1xf32> to vector<64x64xf32>
    %79 = arith.mulf %78, %57 : vector<64x64xf32>
    %cst_24 = arith.constant dense<0.000000e+00> : vector<64xf32>
    %80 = vector.multi_reduction <add>, %79, %cst_24 [0] : vector<64x64xf32> to vector<64xf32>
    %81 = vector.shape_cast %80 : vector<64xf32> to vector<1x64xf32>
    %82 = arith.addf %77, %81 : vector<1x64xf32>
    %83 = vector.broadcast %75 : vector<1x1xf32> to vector<1x64xf32>
    %84 = arith.divf %82, %83 : vector<1x64xf32>
    %85 = tpu.concatenate %50, %84 in 1 : vector<1x64xf32>, vector<1x64xf32> -> vector<1x128xf32>
    %c0_25 = arith.constant 0 : index
    %c0_26 = arith.constant 0 : index
    %86 = vector.load %arg6[%c0_25, %c0_26] : memref<128x128xf32, #tpu.memory_space<vmem>>, vector<128x128xf32>
    %cst_27 = arith.constant dense<0.000000e+00> : vector<1x128xf32>
    %87 = tpu.matmul %85, %86, %cst_27 {dimension_numbers = #tpu.dot_dimension_numbers<[1], [0], [0], [1], [0, 0, 1, 1], [], []>} : vector<1x128xf32>, vector<128x128xf32>, vector<1x128xf32> -> vector<1x128xf32>
    %c0_28 = arith.constant 0 : index
    %c0_29 = arith.constant 0 : index
    %88 = vector.load %arg7[%c0_28, %c0_29] : memref<1x128xf32, #tpu.memory_space<vmem>>, vector<1x128xf32>
    %89 = arith.addf %87, %88 : vector<1x128xf32>
    %c0_30 = arith.constant 0 : index
    %c0_31 = arith.constant 0 : index
    %c0_32 = arith.constant 0 : index
    %90 = vector.load %arg8[%c0_30, %c0_31, %c0_32] : memref<1x1x128xf32, #tpu.memory_space<vmem>>, vector<1x1x128xf32>
    %91 = vector.shape_cast %90 : vector<1x1x128xf32> to vector<1x128xf32>
    %92 = vector.shape_cast %89 : vector<1x128xf32> to vector<1x1x128xf32>
    tpu.vector_store %arg8[%c0_30, %c0_31, %c0_32], %92 {strides = array<i32>} : memref<1x1x128xf32, #tpu.memory_space<vmem>>, vector<1x1x128xf32>,
    return
  }
  func.func @transform_0(%arg0: i32) -> (i32, i32, i32) {
    %c0_i32 = arith.constant 0 : i32
    %c0_i32_0 = arith.constant 0 : i32
    %c0_i32_1 = arith.constant 0 : i32
    return %arg0, %c0_i32, %c0_i32_0 : i32, i32, i32
  }
  func.func @transform_1(%arg0: i32) -> (i32, i32) {
    %c0_i32 = arith.constant 0 : i32
    %c0_i32_0 = arith.constant 0 : i32
    %c0_i32_1 = arith.constant 0 : i32
    return %c0_i32, %c0_i32_0 : i32, i32
  }
  func.func @transform_2(%arg0: i32) -> (i32, i32) {
    %c0_i32 = arith.constant 0 : i32
    %c0_i32_0 = arith.constant 0 : i32
    %c0_i32_1 = arith.constant 0 : i32
    return %c0_i32, %c0_i32_0 : i32, i32
  }
  func.func @transform_3(%arg0: i32) -> (i32, i32) {
    %c0_i32 = arith.constant 0 : i32
    %c0_i32_0 = arith.constant 0 : i32
    %c0_i32_1 = arith.constant 0 : i32
    return %c0_i32, %c0_i32_0 : i32, i32
  }
  func.func @transform_4(%arg0: i32) -> (i32, i32) {
    %c0_i32 = arith.constant 0 : i32
    %c0_i32_0 = arith.constant 0 : i32
    %c0_i32_1 = arith.constant 0 : i32
    return %c0_i32, %c0_i32_0 : i32, i32
  }
  func.func @transform_5(%arg0: i32) -> (i32, i32) {
    %c0_i32 = arith.constant 0 : i32
    %c0_i32_0 = arith.constant 0 : i32
    %c0_i32_1 = arith.constant 0 : i32
    return %c0_i32, %c0_i32_0 : i32, i32
  }
  func.func @transform_6(%arg0: i32) -> (i32, i32) {
    %c0_i32 = arith.constant 0 : i32
    %c0_i32_0 = arith.constant 0 : i32
    %c0_i32_1 = arith.constant 0 : i32
    return %c0_i32, %c0_i32_0 : i32, i32
  }
  func.func @transform_7(%arg0: i32) -> (i32, i32, i32) {
    %c0_i32 = arith.constant 0 : i32
    %c0_i32_0 = arith.constant 0 : i32
    %c0_i32_1 = arith.constant 0 : i32
    return %arg0, %c0_i32, %c0_i32_0 : i32, i32, i32
  }
}

</mosaic_0001>

<bundles_post_ra>
// kernel: attention_pool_2d.1
= control target key start
LH: loop header
LB: loop body
LE: loop exit
PB: predicated region body
PF: predicated region fallthrough
CT: control target
= control target key end

     0   :  { %12 = vsyncpa [#allocation3], 0  ;;  %s2246_s0 = inlined_call_operand.vmem [shape: f32[2,64,128], index: 0, kind: input, shape index: {}]   ;;  %s2247_s1 = inlined_call_operand.vmem [shape: f32[1,128], index: 1, kind: input, shape index: {}]   ;;  %s2248_s2 = inlined_call_operand.vmem [shape: f32[64,128], index: 2, kind: input, shape index: {}]   ;;  %s2249_s3 = inlined_call_operand.vmem [shape: f32[128,384], index: 3, kind: input, shape index: {}]   ;;  %s2250_s4 = inlined_call_operand.vmem [shape: f32[1,384], index: 4, kind: input, shape index: {}]   ;;  %s2251_s5 = inlined_call_operand.vmem [shape: f32[128,128], index: 5, kind: input, shape index: {}]   ;;  %s2252_s6 = inlined_call_operand.vmem [shape: f32[1,128], index: 6, kind: input, shape index: {}]   ;;  %s2253_s7 = inlined_call_operand.hbm [shape: f32[2,1,128], index: 7, kind: output, shape index: {}]  }
   0x1   :  { %14 = vsyncpa [#allocation3 + $0x1], 0  ;;  %s1550_s24 = smov 0   ;;  %s1552_s25 = smov 0  }
   0x2   :  { %s1554_s26 = smov 0   ;;  %s1556_s27 = smov 0  }
   0x3 LB: > { %s1571_s28 = sadd.s32 4294967295, %s1504_s27   ;;  %s1180_s29 = sadd.s32 4294967294, %s1504_s27   ;;  %s1504_s27 = sphi %s1556_s27, %s2259_s27   ;;  %s1500_s26 = sphi %s1554_s26, %s2258_s26   ;;  %s1496_s25 = sphi %s1552_s25, %s2257_s25   ;;  %s1492_s24 = sphi %s1550_s24, %s2256_s24  }
   0x4   : > { %s1575_s30 = sadd.s32 1, %s1504_s27   ;;  %s179_s8 = sadd.s32 1, %s1500_s26 }
   0x5   : > { %s176_s9 = ssub.s32 %s1504_s27, %s1575_s30  ;;  %p189_p0 = scmp.ne.s32.totalorder %s1500_s26, %s1496_s25 }
   0x6   : > { %p177_p1 = scmp.eq.s32.totalorder %s176_s9, 0  ;;  %p190_p2 = scmp.eq.s32.totalorder %s1571_s28, 1 }
   0x7   : > { %p195_p3 = scmp.ne.s32.totalorder %s1496_s25, %s1492_s24  ;;  %p196_p4 = scmp.eq.s32.totalorder %s1180_s29, 1 }
   0x8   : > { %s1586_s10 = scalar_select %p177_p1, %s1500_s26, %s179_s8  }
   0x9   : > { %p1588_p5 = por %p190_p2, %p189_p0  ;;  %p1592_p6 = por %p196_p4, %p195_p3 }
   0xa   : > { %p1183_p7 = scmp.ge.s32.totalorder %s1504_s27, 1  ;;  %p240_p8 = scmp.lt.s32.totalorder %s1504_s27, 3 }
   0xc   : > { %p241_p9 = pnand %p1183_p7, %p240_p8 }
   0xd   : > { %p271_p10 = scmp.lt.s32.totalorder (!%p241_p9), %s1571_s28, 1  ;;  %s1508_s29 = smov (!%p241_p9), 64  }
   0xe   : > { %244 = sbr.rel (%p241_p9) target bundleno = 862 (0x35e), region = 48  ;;  %s269_s15 = sand.u32 (!%p241_p9), 1, %s1496_s25  }
   0xf   : > { %s1186_s18 = sshll.u32 (!%p241_p9), %s1571_s28, 4  ;;  %s270_s19 = scalar_lea.vmem (!%p241_p9), [#allocation2], %s269_s15 }
  0x10   : > { %s2211_s22 = scalar_lea.hbm (!%p241_p9), %s2253_s7, %s1186_s18  ;;  %s1509_s9 = smov (!%p241_p9), [#allocation2]  }
  0x13   : > { %v1601_v0 = vld [vmem:[%s2249_s3 + $0x170] sm:$0xff]  ;;  %v1606_v1 = vld [vmem:[%s2249_s3 + $0x168] sm:$0xff]  ;;  %v1611_v2 = vld [vmem:[%s2249_s3 + $0x158] sm:$0xff]  ;;  %v1506_v4 = vmov 0.0   ;;  %s272_s23 = scalar_select %p271_p10, %s1571_s28, 1  ;;  %v366_v11 = vlaneseq  ;;  %vm1507_vm0 = vmmov 0  }
  0x14   : > { %381 = vmatprep.subr.mxu0 %v1601_v0  ;;  %v1618_v3 = vld [vmem:[%s2249_s3 + $0x150] sm:$0xff]  ;;  %445 = vmatprep.mubr.f32.mxu0 %v1506_v4  ;;  %v1625_v5 = vld [vmem:[%s2249_s3 + $0x140] sm:$0xff]  ;;  %v1633_v6 = vld [vmem:[%s2249_s3 + $0x138] sm:$0xff]  ;;  %vm750_vm1 = vcmask 523264   ;;  %vm734_vm2 = vcmask 516096   ;;  %vm998_vm3 = vcmask 1048064  }
  0x15   : > { %382 = vmatpush1.msra.mxu0 %v1606_v1  ;;  %1248 = vmatprep.subr.mxu1 %v1506_v4  ;;  %v1639_v7 = vld [vmem:[%s2249_s3 + $0x128] sm:$0xff]  ;;  %s1189_s14 = sshll.u32 %s272_s23, 6  ;;  %v1645_v8 = vld [vmem:[%s2249_s3 + $0x120] sm:$0xff]  ;;  %v1651_v9 = vld [vmem:[%s2249_s3 + $0x110] sm:$0xff]  ;;  %v1697_v19 = vshrl.u32 %v366_v11, 7  ;;  %s1448_s28 = sshll.u32 %s1509_s9, 4  ;;  %s1449_s28 = int_to_ptr.vmem [resolvable:$false] %s1448_s28 }
  0x16   : > { %383 = vmatprep.subr.mxu0 %v1611_v2  ;;  %v1657_v10 = vld [vmem:[%s2249_s3 + $0x108] sm:$0xff]  ;;  %s1662_s23 = scalar_lea.vmem %s2246_s0, %s1189_s14  ;;  %v1668_v12 = vld [vmem:[%s2249_s3 + $0xf8] sm:$0xff]  ;;  %v1674_v13 = vld [vmem:[%s2249_s3 + $0xf0] sm:$0xff]  ;;  %1280 = vmatprep.mubr.msk.f32.mxu1 %vm1507_vm0, %v1506_v4  ;;  %s1450_s13 = scalar_lea.vmem %s1449_s28, 32 }
  0x17   : > { %384 = vmatpush1.msra.mxu0 %v1618_v3  ;;  %v1680_v14 = vld [vmem:[%s2249_s3 + $0xe0] sm:$0xff]  ;;  %v1689_v16 = vld [vmem:[%s2249_s3 + $0xd8] sm:$0xff]  ;;  %v1692_v17 = vld [vmem:[%s1662_s23 + $0x8] sm:$0xff]  ;;  %v376_v24 = vsub.s32 2, %v1697_v19 }
  0x18   : > { %385 = vmatprep.subr.mxu0 %v1625_v5  ;;  %v1683_v15 = vld [vmem:[%s1662_s23] sm:$0xff]  ;;  %v1695_v18 = vld [vmem:[%s1662_s23 + $0x10] sm:$0xff]  ;;  %v1703_v20 = vld [vmem:[%s2249_s3 + $0xc8] sm:$0xff] }
  0x19   : > { %386 = vmatpush1.msra.mxu0 %v1633_v6  ;;  %v284_v21 = vadd.f32 %v1692_v17, %v1683_v15  ;;  %v1711_v22 = vld [vmem:[%s2249_s3 + $0xc0] sm:$0xff]  ;;  %v1714_v23 = vld [vmem:[%s1662_s23 + $0x18] sm:$0xff]  ;;  %v1721_v25 = vld [vmem:[%s2249_s3 + $0xb0] sm:$0xff] }
  0x1a   : > { %387 = vmatprep.subr.mxu0 %v1639_v7  ;;  %v1728_v27 = vld [vmem:[%s2249_s3 + $0xa8] sm:$0xff]  ;;  %v1731_v28 = vld [vmem:[%s1662_s23 + $0x20] sm:$0xff]  ;;  %v1737_v29 = vld [vmem:[%s2249_s3 + $0x98] sm:$0xff] }
  0x1b   : > { %388 = vmatpush1.msra.mxu0 %v1645_v8  ;;  %v285_v26 = vadd.f32 %v284_v21, %v1695_v18  ;;  %v1743_v31 = vld [vmem:[%s2250_s4] sm:$0x7]  ;;  %v1749_v32 = vld [vmem:[%s2249_s3 + $0x90] sm:$0xff]  ;;  %v1752_v33 = vld [vmem:[%s1662_s23 + $0x28] sm:$0xff] }
  0x1c   : > { %389 = vmatprep.subr.mxu0 %v1651_v9  ;;  %v1755_v34 = vrot.slane %v1743_v31, %v376_v24  ;;  %v332_v35 = vld [vmem:[%s2249_s3 + $0x80] sm:$0xff]  ;;  %v331_v37 = vld [vmem:[%s2249_s3 + $0x78] sm:$0xff]  ;;  %v1767_v38 = vld [vmem:[%s1662_s23 + $0x30] sm:$0xff] }
  0x1d   : > { %390 = vmatpush1.msra.mxu0 %v1657_v10  ;;  %v286_v30 = vadd.f32 %v285_v26, %v1714_v23  ;;  %v329_v39 = vld [vmem:[%s2249_s3 + $0x68] sm:$0xff]  ;;  %v328_v41 = vld [vmem:[%s2249_s3 + $0x60] sm:$0xff]  ;;  %v1778_v42 = vld [vmem:[%s1662_s23 + $0x38] sm:$0xff]  ;;  %s1125_s23 = sshll.u32 %s270_s19, 4  ;;  %s1126_s23 = int_to_ptr.vmem [resolvable:$true] %s1125_s23 }
  0x1e   : > { %391 = vmatprep.subr.mxu0 %v1668_v12  ;;  %v326_v43 = vld [vmem:[%s2249_s3 + $0x50] sm:$0xff]  ;;  %v325_v45 = vld [vmem:[%s2249_s3 + $0x48] sm:$0xff]  ;;  %v323_v46 = vld [vmem:[%s2249_s3 + $0x38] sm:$0xff]  ;;  %s1444_s8 = scalar_lea.vmem %s1126_s23, 16  ;;  %p1451_p0 = scmp.lt.s32.totalorder %s1126_s23, %s1449_s28 }
  0x1f   : > { %392 = vmatpush1.msra.mxu0 %v1674_v13  ;;  %v287_v36 = vadd.f32 %v286_v30, %v1731_v28  ;;  %v322_v48 = vld [vmem:[%s2249_s3 + $0x30] sm:$0xff]  ;;  %v320_v49 = vld [vmem:[%s2249_s3 + $0x20] sm:$0xff]  ;;  %v319_v51 = vld [vmem:[%s2249_s3 + $0x18] sm:$0xff]  ;;  %p1445_p11 = scmp.ne.s32.totalorder %s1126_s23, %s1444_s8  ;;  %p1452_p1 = scmp.lt.s32.totalorder %s1450_s13, %s1444_s8 }
  0x20   : > { %393 = vmatprep.subr.mxu0 %v1680_v14  ;;  %v317_v52 = vld [vmem:[%s2249_s3 + $0x8] sm:$0xff]  ;;  %v316_v54 = vld [vmem:[%s2249_s3] sm:$0xff]  ;;  %v306_v11 = vld [vmem:[%s2248_s2 + $0x30] sm:$0xff] }
  0x21   : > { %394 = vmatpush1.msra.mxu0 %v1689_v16  ;;  %v288_v40 = vadd.f32 %v287_v36, %v1752_v33  ;;  %v298_v59 = vld [vmem:[%s2247_s1] sm:$0x1]  ;;  %v339_v24 = vld [vmem:[%s2249_s3 + $0xb8] sm:$0xff]  ;;  %v333_v26 = vld [vmem:[%s2249_s3 + $0x88] sm:$0xff]  ;;  %p1446_p12 = pnand %p1445_p11, %p1588_p5  ;;  %p1453_p2 = por %p1452_p1, %p1451_p0 }
  0x22   : > { %395 = vmatprep.subr.mxu0 %v1703_v20  ;;  %v300_v62 = vld [vmem:[%s2248_s2] sm:$0xff]  ;;  %v321_v30 = vld [vmem:[%s2249_s3 + $0x28] sm:$0xff] }
  0x23   : > { %396 = vmatpush1.msra.mxu0 %v1711_v22  ;;  %v289_v44 = vadd.f32 %v288_v40, %v1767_v38  ;;  %v1837_v63 = vadd.f32 %v300_v62, %v1683_v15  ;;  %v363_v15 = vld [vmem:[%s2249_s3 + $0x178] sm:$0xff]  ;;  %v348_v21 = vld [vmem:[%s2249_s3 + $0x100] sm:$0xff]  ;;  %p1447_p13 = pneg %p1446_p12 }
  0x24   : > { %397 = vmatprep.subr.mxu0 %v1721_v25  ;;  %1249 = vmatpush3.msra.mxu1 %v363_v15 }
  0x25   : > { %398 = vmatpush1.msra.mxu0 %v1728_v27  ;;  %v290_v47 = vadd.f32 %v289_v44, %v1778_v42  ;;  %1250 = vmatprep.subr.mxu1 %v1506_v4  ;;  %p1454_p3 = pnand %p1453_p2, %p1447_p13 }
  0x26   : > { %399 = vmatprep.subr.mxu0 %v1737_v29 }
  0x27   : > { %400 = vmatpush1.msra.mxu0 %v1749_v32  ;;  %v291_v50 = vrot.slane %v290_v47, 4 }
  0x28   : > { %401 = vmatprep.subr.mxu0 %v332_v35 }
  0x29   : > { %402 = vmatpush1.msra.mxu0 %v331_v37  ;;  %v292_v53 = vadd.f32 %v291_v50, %v290_v47 }
  0x2a   : > { %403 = vmatprep.subr.mxu0 %v329_v39 }
  0x2b   : > { %404 = vmatpush1.msra.mxu0 %v328_v41  ;;  %v293_v55 = vrot.slane %v292_v53, 2 }
  0x2c   : > { %405 = vmatprep.subr.mxu0 %v326_v43 }
  0x2d   : > { %406 = vmatpush1.msra.mxu0 %v325_v45  ;;  %v294_v56 = vadd.f32 %v293_v55, %v292_v53 }
  0x2e   : > { %407 = vmatprep.subr.mxu0 %v323_v46 }
  0x2f   : > { %408 = vmatpush1.msra.mxu0 %v322_v48  ;;  %v295_v57 = vrot.slane %v294_v56, 1 }
  0x30   : > { %409 = vmatprep.subr.mxu0 %v320_v49 }
  0x31   : > { %410 = vmatpush1.msra.mxu0 %v319_v51  ;;  %v296_v58 = vadd.f32 %v295_v57, %v294_v56 }
  0x32   : > { %411 = vmatprep.subr.mxu0 %v317_v52 }
  0x33   : > { %412 = vmatpush1.msra.mxu0 %v316_v54  ;;  %v297_v60 = vmul.f32 0.015625, %v296_v58 }
  0x34   : > { %522 = vmatprep.subr.mxu0 %v1601_v0  ;;  %v301_v0 = vld [vmem:[%s2248_s2 + $0x8] sm:$0xff] }
  0x35   : > { %v1810_v61 = vadd.f32 %v298_v59, %v297_v60 }
  0x37   : > { %446 = vmatmul.mubr.f32.vlgmr.msra.gmra.mxu0 %v1810_v61 }
  0x38   : > { %523 = vmatpush1.msra.mxu0 %v1606_v1  ;;  %586 = vmatprep.mubr.f32.mxu0 %v1506_v4  ;;  %v1844_v1 = vadd.f32 %v301_v0, %v1692_v17  ;;  %v357_v17 = vld [vmem:[%s2249_s3 + $0x148] sm:$0xff] }
  0x39   : > { %524 = vmatprep.subr.mxu0 %v1611_v2  ;;  %v302_v2 = vld [vmem:[%s2248_s2 + $0x10] sm:$0xff] }
  0x3a   : > { %525 = vmatpush1.msra.mxu0 %v1618_v3  ;;  %v1853_v3 = vadd.f32 %v302_v2, %v1695_v18  ;;  %v354_v18 = vld [vmem:[%s2249_s3 + $0x130] sm:$0xff] }
  0x3b   : > { %526 = vmatprep.subr.mxu0 %v1625_v5  ;;  %v303_v5 = vld [vmem:[%s2248_s2 + $0x18] sm:$0xff] }
  0x3c   : > { %527 = vmatpush1.msra.mxu0 %v1633_v6  ;;  %v1861_v6 = vadd.f32 %v303_v5, %v1714_v23  ;;  %v342_v23 = vld [vmem:[%s2249_s3 + $0xd0] sm:$0xff] }
  0x3d   : > { %528 = vmatprep.subr.mxu0 %v1639_v7  ;;  %v304_v7 = vld [vmem:[%s2248_s2 + $0x20] sm:$0xff] }
  0x3e   : > { %529 = vmatpush1.msra.mxu0 %v1645_v8  ;;  %v1869_v8 = vadd.f32 %v304_v7, %v1731_v28  ;;  %v327_v28 = vld [vmem:[%s2249_s3 + $0x58] sm:$0xff] }
  0x3f   : > { %530 = vmatprep.subr.mxu0 %v1651_v9  ;;  %v305_v9 = vld [vmem:[%s2248_s2 + $0x28] sm:$0xff] }
  0x40   : > { %531 = vmatpush1.msra.mxu0 %v1657_v10  ;;  %v1877_v10 = vadd.f32 %v305_v9, %v1752_v33  ;;  %v1972_v33 = vsub.s32 0, %v1697_v19 }
  0x41   : > { %532 = vmatprep.subr.mxu0 %v1668_v12  ;;  %v1885_v12 = vadd.f32 %v306_v11, %v1767_v38  ;;  %v372_v38 = vsub.s32 1, %v1697_v19 }
  0x42   : > { %533 = vmatpush1.msra.mxu0 %v1674_v13  ;;  %v307_v13 = vld [vmem:[%s2248_s2 + $0x38] sm:$0xff] }
  0x43   : > { %534 = vmatprep.subr.mxu0 %v1680_v14  ;;  %v1893_v14 = vadd.f32 %v307_v13, %v1778_v42  ;;  %v373_v42 = vrot.slane %v1743_v31, %v372_v38 }
  0x44   : > { %535 = vmatpush1.msra.mxu0 %v1689_v16  ;;  %v360_v16 = vld [vmem:[%s2249_s3 + $0x160] sm:$0xff] }
  0x45   : > { %536 = vmatprep.subr.mxu0 %v1703_v20  ;;  %1251 = vmatpush3.msra.mxu1 %v360_v16  ;;  %v351_v20 = vld [vmem:[%s2249_s3 + $0x118] sm:$0xff] }
  0x46   : > { %537 = vmatpush1.msra.mxu0 %v1711_v22  ;;  %1252 = vmatprep.subr.mxu1 %v1506_v4  ;;  %v345_v22 = vld [vmem:[%s2249_s3 + $0xe8] sm:$0xff] }
  0x47   : > { %538 = vmatprep.subr.mxu0 %v1721_v25  ;;  %1253 = vmatpush3.msra.mxu1 %v357_v17  ;;  %v336_v25 = vld [vmem:[%s2249_s3 + $0xa0] sm:$0xff] }
  0x48   : > { %539 = vmatpush1.msra.mxu0 %v1728_v27  ;;  %1254 = vmatprep.subr.mxu1 %v1506_v4  ;;  %v330_v27 = vld [vmem:[%s2249_s3 + $0x70] sm:$0xff] }
  0x49   : > { %540 = vmatprep.subr.mxu0 %v1737_v29  ;;  %1255 = vmatpush3.msra.mxu1 %v354_v18  ;;  %v324_v29 = vld [vmem:[%s2249_s3 + $0x40] sm:$0xff] }
  0x4a   : > { %541 = vmatpush1.msra.mxu0 %v1749_v32  ;;  %1256 = vmatprep.subr.mxu1 %v1506_v4  ;;  %v318_v32 = vld [vmem:[%s2249_s3 + $0x10] sm:$0xff] }
  0x4b   : > { %542 = vmatprep.subr.mxu0 %v332_v35  ;;  %1257 = vmatpush3.msra.mxu1 %v351_v20  ;;  %v369_v35 = vrot.slane %v1743_v31, %v1972_v33 }
  0x4c   : > { %543 = vmatpush1.msra.mxu0 %v331_v37  ;;  %1258 = vmatprep.subr.mxu1 %v1506_v4 }
  0x4d   : > { %544 = vmatprep.subr.mxu0 %v329_v39  ;;  %1259 = vmatpush3.msra.mxu1 %v348_v21 }
  0x4e   : > { %545 = vmatpush1.msra.mxu0 %v328_v41  ;;  %1260 = vmatprep.subr.mxu1 %v1506_v4 }
  0x4f   : > { %546 = vmatprep.subr.mxu0 %v326_v43  ;;  %1261 = vmatpush3.msra.mxu1 %v345_v22 }
  0x50   : > { %547 = vmatpush1.msra.mxu0 %v325_v45  ;;  %1262 = vmatprep.subr.mxu1 %v1506_v4 }
  0x51   : > { %548 = vmatprep.subr.mxu0 %v323_v46  ;;  %1263 = vmatpush3.msra.mxu1 %v342_v23 }
  0x52   : > { %549 = vmatpush1.msra.mxu0 %v322_v48  ;;  %1264 = vmatprep.subr.mxu1 %v1506_v4 }
  0x53   : > { %550 = vmatprep.subr.mxu0 %v320_v49  ;;  %1265 = vmatpush3.msra.mxu1 %v339_v24 }
  0x54   : > { %551 = vmatpush1.msra.mxu0 %v319_v51  ;;  %1266 = vmatprep.subr.mxu1 %v1506_v4 }
  0x55   : > { %552 = vmatprep.subr.mxu0 %v317_v52  ;;  %1267 = vmatpush3.msra.mxu1 %v336_v25 }
  0x56   : > { %553 = vmatpush1.msra.mxu0 %v316_v54  ;;  %1268 = vmatprep.subr.mxu1 %v1506_v4 }
  0x57   : > { %587 = vmatmul.mubr.f32.vlgmr.msra.gmra.mxu0 %v1837_v63  ;;  %1327 = vmatprep.subr.mxu0 %v1506_v4 }
  0x58   : > { %591 = vmatprep.mubr.f32.mxu0 %v1506_v4  ;;  %1269 = vmatpush3.msra.mxu1 %v333_v26 }
  0x59   : > { %1270 = vmatprep.subr.mxu1 %v1506_v4 }
  0x5a   : > { %1271 = vmatpush3.msra.mxu1 %v330_v27 }
  0x5b   : > { %592 = vmatmul.mubr.f32.gmra.mxu0 %v1844_v1  ;;  %1272 = vmatprep.subr.mxu1 %v1506_v4 }
  0x5c   : > { %596 = vmatprep.mubr.f32.mxu0 %v1506_v4  ;;  %1273 = vmatpush3.msra.mxu1 %v327_v28 }
  0x5d   : > { %1274 = vmatprep.subr.mxu1 %v1506_v4 }
  0x5e   : > { %1275 = vmatpush3.msra.mxu1 %v324_v29 }
  0x5f   : > { %597 = vmatmul.mubr.f32.gmra.mxu0 %v1853_v3  ;;  %1276 = vmatprep.subr.mxu1 %v1506_v4 }
  0x60   : > { %601 = vmatprep.mubr.f32.mxu0 %v1506_v4  ;;  %1277 = vmatpush3.msra.mxu1 %v321_v30 }
  0x61   : > { %1278 = vmatprep.subr.mxu1 %v1506_v4 }
  0x62   : > { %1279 = vmatpush3.msra.mxu1 %v318_v32 }
  0x63   : > { %602 = vmatmul.mubr.f32.gmra.mxu0 %v1861_v6  ;;  %1283 = vmatprep.subr.mxu1 %v363_v15 }
  0x64   : > { %606 = vmatprep.mubr.f32.mxu0 %v1506_v4  ;;  %1281 = vmatmul.mubr.f32.vlgmr.msra.gmra.mxu1 %v1810_v61 }
  0x65   : > { %1284 = vmatpush3.msra.mxu1 %v363_v15  ;;  %1315 = vmatprep.mubr.f32.mxu1 %v1837_v63 }
  0x66   : > { %1285 = vmatprep.subr.mxu1 %v360_v16 }
  0x67   : > { %607 = vmatmul.mubr.f32.gmra.mxu0 %v1869_v8  ;;  %1286 = vmatpush3.msra.mxu1 %v360_v16 }
  0x68   : > { %611 = vmatprep.mubr.f32.mxu0 %v1506_v4  ;;  %1287 = vmatprep.subr.mxu1 %v357_v17 }
  0x69   : > { %1288 = vmatpush3.msra.mxu1 %v357_v17 }
  0x6a   : > { %1289 = vmatprep.subr.mxu1 %v354_v18 }
  0x6b   : > { %612 = vmatmul.mubr.f32.gmra.mxu0 %v1877_v10  ;;  %1290 = vmatpush3.msra.mxu1 %v354_v18 }
  0x6c   : > { %616 = vmatprep.mubr.f32.mxu0 %v1506_v4  ;;  %1291 = vmatprep.subr.mxu1 %v351_v20 }
  0x6d   : > { %1292 = vmatpush3.msra.mxu1 %v351_v20 }
  0x6e   : > { %1293 = vmatprep.subr.mxu1 %v348_v21 }
  0x6f   : > { %617 = vmatmul.mubr.f32.gmra.mxu0 %v1885_v12  ;;  %1294 = vmatpush3.msra.mxu1 %v348_v21 }
  0x70   : > { %621 = vmatprep.mubr.f32.mxu0 %v1506_v4  ;;  %1295 = vmatprep.subr.mxu1 %v345_v22 }
  0x71   : > { %1296 = vmatpush3.msra.mxu1 %v345_v22 }
  0x72   : > { %1297 = vmatprep.subr.mxu1 %v342_v23 }
  0x73   : > { %622 = vmatmul.mubr.f32.gmra.mxu0 %v1893_v14  ;;  %1298 = vmatpush3.msra.mxu1 %v342_v23 }
  0x74   : > { %1359 = vmatprep.mubr.msk.f32.mxu0 %vm1507_vm0, %v1506_v4  ;;  %1299 = vmatprep.subr.mxu1 %v339_v24 }
  0x75   : > { %1300 = vmatpush3.msra.mxu1 %v339_v24 }
  0x76   : > { %1301 = vmatprep.subr.mxu1 %v336_v25 }
  0x77   : > { %1302 = vmatpush3.msra.mxu1 %v336_v25 }
  0x78   : > { %1303 = vmatprep.subr.mxu1 %v333_v26 }
  0x79   : > { %1304 = vmatpush3.msra.mxu1 %v333_v26 }
  0x7a   : > { %1305 = vmatprep.subr.mxu1 %v330_v27 }
  0x7b   : > { %1306 = vmatpush3.msra.mxu1 %v330_v27 }
  0x7c   : > { %1307 = vmatprep.subr.mxu1 %v327_v28 }
  0x7d   : > { %1308 = vmatpush3.msra.mxu1 %v327_v28 }
  0x7e   : > { %1309 = vmatprep.subr.mxu1 %v324_v29 }
  0x7f   : > { %1310 = vmatpush3.msra.mxu1 %v324_v29 }
  0x80   : > { %1311 = vmatprep.subr.mxu1 %v321_v30 }
  0x81   : > { %1312 = vmatpush3.msra.mxu1 %v321_v30 }
  0x82   : > { %1313 = vmatprep.subr.mxu1 %v318_v32 }
  0x83   : > { %1314 = vmatpush3.msra.mxu1 %v318_v32 }
  0x84   : > { %1316 = vmatmul.mubr.f32.vlgmr.msra.gmra.mxu1 %v1844_v1 }
  0x85   : > { %1318 = vmatprep.mubr.f32.mxu1 %v1853_v3 }
  0x88   : > { %1319 = vmatmul.mubr.f32.gmra.mxu1 %v1861_v6 }
  0x89   : > { %1321 = vmatprep.mubr.f32.mxu1 %v1869_v8 }
  0x8c   : > { %1322 = vmatmul.mubr.f32.gmra.mxu1 %v1877_v10 }
  0x8d   : > { %1324 = vmatprep.mubr.f32.mxu1 %v1885_v12 }
  0x90   : > { %1325 = vmatmul.mubr.f32.gmra.mxu1 %v1893_v14 }
  0xf7   : > { %v447_v36 = vpop.f32.mrf.mxu0 }
  0xf8   : > { %v448_v37 = vadd.f32 %v447_v36, %v369_v35 }
  0xf9   : > { %v449_v39 = vpop.f32.mrf.mxu0 }
  0xfa   : > { %v732_v40 = vmul.f32 0.125, %v448_v37  ;;  %v450_v6 = vadd.f32 %v449_v39, %v373_v42 }
  0xfc   : > { %v741_v44 = vrot.slane %v732_v40, %v1972_v33  ;;  %v733_v10 = vmul.f32 %v732_v40, %v450_v6 }
  0xfe   : > { %v735_v40 = vsel %vm734_vm2, %v733_v10, 0.0 }
 0x117   : > { %v588_v41 = vpop.f32.mrf.mxu0 }
 0x119   : > { %v589_v43 = vpop.f32.mrf.mxu0 }
 0x11a   : > { %v590_v45 = vadd.f32 %v589_v43, %v373_v42 }
 0x11b   : > { %v593_v46 = vpop.f32.mrf.mxu0 }
 0x11c   : > { %v742_v47 = vmul.f32 %v741_v44, %v590_v45  ;;  %v1039_v46 = vld [vmem:[%s2251_s5 + $0x78] sm:$0xff] }
 0x11d   : > { %v594_v48 = vpop.f32.mrf.mxu0  ;;  %1328 = vmatpush3.msra.mxu0 %v1039_v46 }
 0x11e   : > { %v595_v49 = vadd.f32 %v594_v48, %v373_v42  ;;  %882 = vrot.lane.b32.xlu0 %v742_v47, %s1508_s29  ;;  %v751_v14 = vsel %vm750_vm1, %v742_v47, 0.0  ;;  %1329 = vmatprep.subr.mxu0 %v1506_v4  ;;  %v1038_v47 = vld [vmem:[%s2251_s5 + $0x70] sm:$0xff]  ;;  %v1037_v48 = vld [vmem:[%s2251_s5 + $0x68] sm:$0xff] }
 0x11f   : > { %v598_v50 = vpop.f32.mrf.mxu0  ;;  %1330 = vmatpush3.msra.mxu0 %v1038_v47 }
 0x120   : > { %v743_v51 = vmul.f32 %v741_v44, %v595_v49  ;;  %1331 = vmatprep.subr.mxu0 %v1506_v4  ;;  %v1036_v49 = vld [vmem:[%s2251_s5 + $0x60] sm:$0xff]  ;;  %v1035_v50 = vld [vmem:[%s2251_s5 + $0x58] sm:$0xff] }
 0x121   : > { %v599_v52 = vpop.f32.mrf.mxu0  ;;  %1332 = vmatpush3.msra.mxu0 %v1037_v48 }
 0x122   : > { %v600_v19 = vadd.f32 %v599_v52, %v373_v42  ;;  %884 = vrot.lane.b32.xlu0 %v743_v51, %s1508_s29  ;;  %v754_v12 = vsel %vm750_vm1, %v743_v51, 0.0  ;;  %1333 = vmatprep.subr.mxu0 %v1506_v4  ;;  %v1034_v51 = vld [vmem:[%s2251_s5 + $0x50] sm:$0xff] }
 0x123   : > { %v603_v53 = vpop.f32.mrf.mxu0  ;;  %1334 = vmatpush3.msra.mxu0 %v1036_v49 }
 0x124   : > { %v744_v54 = vmul.f32 %v741_v44, %v600_v19  ;;  %v518_v43 = vpop.f32.mrf.mxu1  ;;  %1335 = vmatprep.subr.mxu0 %v1506_v4  ;;  %v1033_v19 = vld [vmem:[%s2251_s5 + $0x48] sm:$0xff] }
 0x125   : > { %v604_v31 = vpop.f32.mrf.mxu0  ;;  %v2005_v45 = vadd.f32 %v518_v43, %v1755_v34  ;;  %1336 = vmatpush3.msra.mxu0 %v1035_v50 }
 0x126   : > { %v605_v55 = vadd.f32 %v604_v31, %v373_v42  ;;  %886 = vrot.lane.b32.xlu1 %v744_v54, %s1508_s29  ;;  %v757_v13 = vsel %vm750_vm1, %v744_v54, 0.0  ;;  %1337 = vmatprep.subr.mxu0 %v1506_v4  ;;  %v1032_v54 = vld [vmem:[%s2251_s5 + $0x40] sm:$0xff]  ;;  %v1031_v31 = vld [vmem:[%s2251_s5 + $0x38] sm:$0xff] }
 0x127   : > { %v608_v56 = vpop.f32.mrf.mxu0  ;;  %1338 = vmatpush3.msra.mxu0 %v1034_v51 }
 0x128   : > { %v745_v57 = vmul.f32 %v741_v44, %v605_v55  ;;  %1339 = vmatprep.subr.mxu0 %v1506_v4  ;;  %v1030_v56 = vld [vmem:[%s2251_s5 + $0x30] sm:$0xff] }
 0x129   : > { %v609_v58 = vpop.f32.mrf.mxu0  ;;  %1340 = vmatpush3.msra.mxu0 %v1033_v19 }
 0x12a   : > { %v610_v59 = vadd.f32 %v609_v58, %v373_v42  ;;  %888 = vrot.lane.b32.xlu1 %v745_v57, %s1508_s29  ;;  %v760_v16 = vsel %vm750_vm1, %v745_v57, 0.0  ;;  %1341 = vmatprep.subr.mxu0 %v1506_v4  ;;  %v1029_v58 = vld [vmem:[%s2251_s5 + $0x28] sm:$0xff] }
 0x12b   : > { %v613_v60 = vpop.f32.mrf.mxu0  ;;  %1342 = vmatpush3.msra.mxu0 %v1032_v54 }
 0x12c   : > { %v746_v61 = vmul.f32 %v741_v44, %v610_v59  ;;  %1343 = vmatprep.subr.mxu0 %v1506_v4  ;;  %v1028_v59 = vld [vmem:[%s2251_s5 + $0x20] sm:$0xff] }
 0x12d   : > { %v614_v62 = vpop.f32.mrf.mxu0  ;;  %1344 = vmatpush3.msra.mxu0 %v1031_v31 }
 0x12e   : > { %v615_v63 = vadd.f32 %v614_v62, %v373_v42  ;;  %890 = vrot.lane.b32.xlu0 %v746_v61, %s1508_s29  ;;  %v763_v15 = vsel %vm750_vm1, %v746_v61, 0.0  ;;  %1345 = vmatprep.subr.mxu0 %v1506_v4  ;;  %v1027_v61 = vld [vmem:[%s2251_s5 + $0x18] sm:$0xff] }
 0x12f   : > { %v618_v0 = vpop.f32.mrf.mxu0  ;;  %1346 = vmatpush3.msra.mxu0 %v1030_v56 }
 0x130   : > { %v747_v1 = vmul.f32 %v741_v44, %v615_v63  ;;  %1347 = vmatprep.subr.mxu0 %v1506_v4  ;;  %v1026_v63 = vld [vmem:[%s2251_s5 + $0x10] sm:$0xff]  ;;  %v1025_v0 = vld [vmem:[%s2251_s5 + $0x8] sm:$0xff] }
 0x131   : > { %v619_v2 = vpop.f32.mrf.mxu0  ;;  %1348 = vmatpush3.msra.mxu0 %v1029_v58 }
 0x132   : > { %v620_v3 = vadd.f32 %v619_v2, %v373_v42  ;;  %892 = vrot.lane.b32.xlu1 %v747_v1, %s1508_s29  ;;  %v766_v18 = vsel %vm750_vm1, %v747_v1, 0.0  ;;  %1349 = vmatprep.subr.mxu0 %v1506_v4  ;;  %v1024_v2 = vld [vmem:[%s2251_s5] sm:$0xff] }
 0x133   : > { %v623_v5 = vpop.f32.mrf.mxu0  ;;  %1350 = vmatpush3.msra.mxu0 %v1028_v59 }
 0x134   : > { %v748_v7 = vmul.f32 %v741_v44, %v620_v3  ;;  %1351 = vmatprep.subr.mxu0 %v1506_v4 }
 0x135   : > { %v624_v8 = vpop.f32.mrf.mxu0  ;;  %1352 = vmatpush3.msra.mxu0 %v1027_v61 }
 0x136   : > { %v625_v9 = vadd.f32 %v624_v8, %v373_v42  ;;  %894 = vrot.lane.b32.xlu0 %v748_v7, %s1508_s29  ;;  %v769_v17 = vsel %vm750_vm1, %v748_v7, 0.0  ;;  %1353 = vmatprep.subr.mxu0 %v1506_v4 }
 0x137   : > { %1354 = vmatpush3.msra.mxu0 %v1026_v63 }
 0x138   : > { %v749_v11 = vmul.f32 %v741_v44, %v625_v9  ;;  %v1282_v44 = vpop.f32.mrf.mxu1  ;;  %1355 = vmatprep.subr.mxu0 %v1506_v4 }
 0x139   : > { %1356 = vmatpush3.msra.mxu0 %v1025_v0 }
 0x13a   : > { %896 = vrot.lane.b32.xlu1 %v749_v11, %s1508_s29  ;;  %868 = vrot.lane.b32.xlu0 %v733_v10, %s1508_s29  ;;  %v772_v20 = vsel %vm750_vm1, %v749_v11, 0.0  ;;  %s1113_s29 = scalar_lea.sflag [#allocation3], %s269_s15 }
 0x13b   : > { %1357 = vmatprep.subr.mxu0 %v1506_v4 }
 0x13c   : > { %1358 = vmatpush3.msra.mxu0 %v1024_v2 }
 0x159   : > { %755 = vadd.xlane.f32.xlu0 %v754_v12 }
 0x15d   : > { %758 = vadd.xlane.f32.xlu0 %v757_v13 }
 0x15e   : > { %752 = vadd.xlane.f32.xlu1 %v751_v14 }
 0x161   : > { %764 = vadd.xlane.f32.xlu0 %v763_v15 }
 0x162   : > { %761 = vadd.xlane.f32.xlu1 %v760_v16 }
 0x165   : > { %770 = vadd.xlane.f32.xlu0 %v769_v17 }
 0x166   : > { %767 = vadd.xlane.f32.xlu1 %v766_v18 }
 0x16a   : > { %773 = vadd.xlane.f32.xlu1 %v772_v20 }
 0x190   : > { %v883_v21 = vpop.permute.xlu0 %882 }
 0x191   : > { %v906_v22 = vsel %vm750_vm1, %v883_v21, 0.0 }
 0x192   : > { %907 = vadd.xlane.f32.xlu0 %v906_v22 }
 0x194   : > { %v885_v23 = vpop.permute.xlu0 %884 }
 0x195   : > { %v909_v24 = vsel %vm750_vm1, %v885_v23, 0.0 }
 0x196   : > { %910 = vadd.xlane.f32.xlu1 %v909_v24 }
 0x198   : > { %v887_v25 = vpop.permute.xlu1 %886 }
 0x199   : > { %v912_v26 = vsel %vm750_vm1, %v887_v25, 0.0 }
 0x19a   : > { %913 = vadd.xlane.f32.xlu0 %v912_v26 }
 0x19c   : > { %v889_v27 = vpop.permute.xlu1 %888 }
 0x19d   : > { %v915_v28 = vsel %vm750_vm1, %v889_v27, 0.0 }
 0x19e   : > { %916 = vadd.xlane.f32.xlu1 %v915_v28 }
 0x1a0   : > { %v891_v29 = vpop.permute.xlu0 %890 }
 0x1a1   : > { %v918_v30 = vsel %vm750_vm1, %v891_v29, 0.0 }
 0x1a2   : > { %919 = vadd.xlane.f32.xlu0 %v918_v30 }
 0x1a4   : > { %v893_v32 = vpop.permute.xlu1 %892 }
 0x1a5   : > { %v921_v35 = vsel %vm750_vm1, %v893_v32, 0.0 }
 0x1a6   : > { %922 = vadd.xlane.f32.xlu1 %v921_v35  ;;  %v1317_v35 = vpop.f32.mrf.mxu1 }
 0x1a8   : > { %v895_v36 = vpop.permute.xlu0 %894  ;;  %v693_v43 = vpop.f32.mrf.mxu1 }
 0x1a9   : > { %v924_v37 = vsel %vm750_vm1, %v895_v36, 0.0 }
 0x1aa   : > { %925 = vadd.xlane.f32.xlu0 %v924_v37  ;;  %v1320_v19 = vpop.f32.mrf.mxu1 }
 0x1ac   : > { %v897_v38 = vpop.permute.xlu1 %896  ;;  %v869_v41 = vpop.permute.xlu0 %868 }
 0x1ad   : > { %v927_v39 = vsel %vm750_vm1, %v897_v38, 0.0  ;;  %v871_v42 = vsel %vm734_vm2, %v869_v41, 0.0  ;;  %v703_v58 = vpop.f32.mrf.mxu1 }
 0x1ae   : > { %928 = vadd.xlane.f32.xlu1 %v927_v39  ;;  %736 = vadd.xlane.f32.xlu0 %v735_v40 }
 0x1b2   : > { %872 = vadd.xlane.f32.xlu1 %v871_v42 }
 0x1e2   : > { %v2035_v53 = vpop.xlane.xlu0 %755 }
 0x1e6   : > { %v2051_v57 = vpop.xlane.xlu0 %758 }
 0x1e7   : > { %v2029_v52 = vpop.xlane.xlu1 %752 }
 0x1ea   : > { %v2067_v62 = vpop.xlane.xlu0 %764 }
 0x1eb   : > { %v2045_v55 = vpop.xlane.xlu1 %761  ;;  %v775_v8 = vmax.f32 %v2029_v52, %v2067_v62 }
 0x1ee   : > { %v2083_v3 = vpop.xlane.xlu0 %770 }
 0x1ef   : > { %v2061_v60 = vpop.xlane.xlu1 %767  ;;  %v777_v6 = vmax.f32 %v2051_v57, %v2083_v3 }
 0x1f0   : > { %v776_v7 = vmax.f32 %v2035_v53, %v2061_v60 }
 0x1f2   : > { %v779_v10 = vmax.f32 %v775_v8, %v776_v7 }
 0x1f3   : > { %v2077_v1 = vpop.xlane.xlu1 %773 }
 0x1f4   : > { %v778_v5 = vmax.f32 %v2045_v55, %v2077_v1 }
 0x1f6   : > { %v780_v9 = vmax.f32 %v777_v6, %v778_v5  ;;  %v2144_v6 = vadd.f32 %v693_v43, %v1755_v34 }
 0x1f8   : > { %v781_v11 = vmax.f32 %v779_v10, %v780_v9 }
 0x1fa   : > { %v782_v12 = vrot.slane %v781_v11, 4 }
 0x1fc   : > { %v783_v13 = vmax.f32 %v781_v11, %v782_v12 }
 0x1fe   : > { %v784_v15 = vrot.slane %v783_v13, 2 }
 0x200   : > { %v785_v17 = vmax.f32 %v783_v13, %v784_v15 }
 0x202   : > { %v786_v21 = vrot.slane %v785_v17, 1 }
 0x204   : > { %v787_v25 = vmax.f32 %v785_v17, %v786_v21  ;;  %v2153_v17 = vadd.f32 %v1320_v19, %v1755_v34 }
 0x21b   : > { %v2094_v14 = vpop.xlane.xlu0 %907 }
 0x21f   : > { %v2096_v16 = vpop.xlane.xlu1 %910 }
 0x223   : > { %v2098_v4 = vpop.xlane.xlu0 %913 }
 0x227   : > { %v2100_v18 = vpop.xlane.xlu1 %916 }
 0x22b   : > { %v2102_v20 = vpop.xlane.xlu0 %919 }
 0x22c   : > { %v930_v28 = vmax.f32 %v2094_v14, %v2102_v20 }
 0x22f   : > { %v2104_v22 = vpop.xlane.xlu1 %922 }
 0x230   : > { %v931_v24 = vmax.f32 %v2096_v16, %v2104_v22 }
 0x232   : > { %v934_v36 = vmax.f32 %v930_v28, %v931_v24 }
 0x233   : > { %v2106_v23 = vpop.xlane.xlu0 %925 }
 0x234   : > { %v932_v29 = vmax.f32 %v2098_v4, %v2106_v23 }
 0x237   : > { %v2110_v26 = vpop.xlane.xlu1 %928  ;;  %v2112_v27 = vpop.xlane.xlu0 %736 }
 0x238   : > { %v933_v30 = vmax.f32 %v2100_v18, %v2110_v26  ;;  %v2121_v32 = vmax.f32 %v787_v25, %v2112_v27 }
 0x23a   : > { %v935_v37 = vmax.f32 %v932_v29, %v933_v30  ;;  %v795_v38 = vrot.slane %v2121_v32, %v1972_v33  ;;  %v789_v43 = vsub.f32 %v2112_v27, %v2121_v32 }
 0x23b   : > { %v2133_v0 = vpop.xlane.xlu1 %872 }
 0x23c   : > { %v936_v39 = vmax.f32 %v934_v36, %v935_v37  ;;  %v796_v40 = vsub.f32 %v2029_v52, %v795_v38  ;;  %v797_v41 = vsub.f32 %v2035_v53, %v795_v38  ;;  %v798_v42 = vsub.f32 %v2051_v57, %v795_v38 }
 0x23d   : > { %v799_v46 = vsub.f32 %v2045_v55, %v795_v38  ;;  %v800_v49 = vsub.f32 %v2067_v62, %v795_v38  ;;  %v801_v54 = vsub.f32 %v2061_v60, %v795_v38  ;;  %v802_v53 = vsub.f32 %v2083_v3, %v795_v38  ;;  %v1323_v60 = vpop.f32.mrf.mxu1 }
 0x23e   : > { %v937_v44 = vrot.slane %v936_v39, 4  ;;  %v804_v47 = vmul.f32 1.442695, %v796_v40  ;;  %v806_v48 = vmul.f32 1.442695, %v797_v41  ;;  %v803_v55 = vsub.f32 %v2077_v1, %v795_v38 }
 0x23f   : > { %v808_v50 = vmul.f32 1.442695, %v798_v42  ;;  %v810_v52 = vmul.f32 1.442695, %v799_v46  ;;  %v812_v56 = vmul.f32 1.442695, %v800_v49  ;;  %v2141_v1 = vadd.f32 %v1317_v35, %v1755_v34  ;;  %v713_v7 = vpop.f32.mrf.mxu1 }
 0x240   : > { %v938_v51 = vmax.f32 %v936_v39, %v937_v44  ;;  %1404 = vpow2.f32 %v804_v47  ;;  %v814_v59 = vmul.f32 1.442695, %v801_v54  ;;  %v816_v62 = vmul.f32 1.442695, %v802_v53 }
 0x241   : > { %1406 = vpow2.f32 %v806_v48  ;;  %v818_v2 = vmul.f32 1.442695, %v803_v55  ;;  %v1326_v30 = vpop.f32.mrf.mxu1  ;;  %v2161_v35 = vadd.f32 %v1323_v60, %v1755_v34  ;;  %v2165_v38 = vadd.f32 %v713_v7, %v1755_v34 }
 0x242   : > { %v939_v31 = vrot.slane %v938_v51, 2  ;;  %1408 = vpow2.f32 %v808_v50 }
 0x243   : > { %1410 = vpow2.f32 %v810_v52 }
 0x244   : > { %v940_v57 = vmax.f32 %v938_v51, %v939_v31  ;;  %1412 = vpow2.f32 %v812_v56  ;;  %v729_v56 = vadd.f32 %v1326_v30, %v1755_v34 }
 0x245   : > { %1414 = vpow2.f32 %v814_v59 }
 0x246   : > { %v941_v61 = vrot.slane %v940_v57, 1  ;;  %1416 = vpow2.f32 %v816_v62 }
 0x247   : > { %1418 = vpow2.f32 %v818_v2 }
 0x248   : > { %v942_v63 = vmax.f32 %v940_v57, %v941_v61  ;;  %v790_v57 = vmul.f32 1.442695, %v789_v43 }
 0x24a   : > { %v2136_v5 = vmax.f32 %v942_v63, %v2133_v0 }
 0x24c   : > { %v950_v3 = vrot.slane %v2136_v5, %v1972_v33 }
 0x24d   : > { %v1405_v8 = vpop.eup %1404 }
 0x24e   : > { %v951_v9 = vsub.f32 %v2094_v14, %v950_v3  ;;  %v952_v10 = vsub.f32 %v2096_v16, %v950_v3  ;;  %v953_v11 = vsub.f32 %v2098_v4, %v950_v3  ;;  %v1407_v12 = vpop.eup %1406  ;;  %v954_v13 = vsub.f32 %v2100_v18, %v950_v3 }
 0x24f   : > { %v955_v33 = vsub.f32 %v2102_v20, %v950_v3  ;;  %v956_v15 = vsub.f32 %v2104_v22, %v950_v3  ;;  %v820_v21 = vadd.f32 %v1407_v12, %v1405_v8  ;;  %v957_v24 = vsub.f32 %v2106_v23, %v950_v3  ;;  %v1409_v16 = vpop.eup %1408 }
 0x250   : > { %v959_v25 = vmul.f32 1.442695, %v951_v9  ;;  %v2157_v14 = vadd.f32 %v703_v58, %v1755_v34  ;;  %v961_v28 = vmul.f32 1.442695, %v952_v10  ;;  %v963_v4 = vmul.f32 1.442695, %v953_v11  ;;  %v1411_v36 = vpop.eup %1410 }
 0x251   : > { %v965_v29 = vmul.f32 1.442695, %v954_v13  ;;  %v836_v18 = vmul.f32 %v1407_v12, %v2141_v1  ;;  %v821_v20 = vadd.f32 %v1409_v16, %v820_v21  ;;  %v967_v22 = vmul.f32 1.442695, %v955_v33  ;;  %v1413_v42 = vpop.eup %1412 }
 0x252   : > { %1420 = vpow2.f32 %v959_v25  ;;  %v958_v23 = vsub.f32 %v2110_v26, %v950_v3  ;;  %v969_v37 = vmul.f32 1.442695, %v956_v15  ;;  %v835_v41 = vmul.f32 %v1405_v8, %v2144_v6  ;;  %v723_v26 = vpop.f32.mrf.mxu1  ;;  %v1415_v50 = vpop.eup %1414 }
 0x253   : > { %1422 = vpow2.f32 %v961_v28  ;;  %v822_v39 = vadd.f32 %v1411_v36, %v821_v20  ;;  %v844_v40 = vsel %vm750_vm1, %v836_v18, 0.0  ;;  %v971_v44 = vmul.f32 1.442695, %v957_v24  ;;  %v1417_v31 = vpop.eup %1416 }
 0x254   : > { %1424 = vpow2.f32 %v963_v4  ;;  %v837_v46 = vmul.f32 %v1409_v16, %v2157_v14  ;;  %v843_v48 = vsel %vm750_vm1, %v835_v41, 0.0  ;;  %v838_v49 = vmul.f32 %v1411_v36, %v2153_v17  ;;  %v1419_v61 = vpop.eup %1418 }
 0x255   : > { %1426 = vpow2.f32 %v965_v29  ;;  %v823_v47 = vadd.f32 %v1413_v42, %v822_v39  ;;  %v973_v51 = vmul.f32 1.442695, %v958_v23  ;;  %v845_v19 = vadd.f32 %v844_v40, %v843_v48 }
 0x256   : > { %1428 = vpow2.f32 %v967_v22  ;;  %v846_v52 = vsel %vm750_vm1, %v837_v46, 0.0  ;;  %v839_v27 = vmul.f32 %v1413_v42, %v2165_v38  ;;  %v724_v32 = vadd.f32 %v723_v26, %v1755_v34 }
 0x257   : > { %1430 = vpow2.f32 %v969_v37  ;;  %v824_v54 = vadd.f32 %v1415_v50, %v823_v47  ;;  %v847_v53 = vadd.f32 %v846_v52, %v845_v19  ;;  %v848_v55 = vsel %vm750_vm1, %v838_v49, 0.0 }
 0x258   : > { %1432 = vpow2.f32 %v971_v44  ;;  %v840_v59 = vmul.f32 %v1415_v50, %v2161_v35  ;;  %v850_v60 = vsel %vm750_vm1, %v839_v27, 0.0  ;;  %v841_v2 = vmul.f32 %v1417_v31, %v724_v32 }
 0x259   : > { %v825_v58 = vadd.f32 %v1417_v31, %v824_v54  ;;  %1434 = vpow2.f32 %v973_v51  ;;  %v849_v62 = vadd.f32 %v848_v55, %v847_v53  ;;  %v842_v9 = vmul.f32 %v1419_v61, %v729_v56 }
 0x25a   : > { %1436 = vpow2.f32 %v790_v57  ;;  %v852_v8 = vsel %vm750_vm1, %v840_v59, 0.0  ;;  %v854_v13 = vsel %vm750_vm1, %v841_v2, 0.0 }
 0x25b   : > { %v826_v63 = vadd.f32 %v1419_v61, %v825_v58  ;;  %v851_v3 = vadd.f32 %v850_v60, %v849_v62  ;;  %v856_v29 = vsel %vm750_vm1, %v842_v9, 0.0 }
 0x25d   : > { %v827_v7 = vrot.slane %v826_v63, 4  ;;  %v853_v10 = vadd.f32 %v852_v8, %v851_v3 }
 0x25f   : > { %v1421_v34 = vpop.eup %1420  ;;  %v855_v24 = vadd.f32 %v854_v13, %v853_v10  ;;  %v828_v16 = vadd.f32 %v827_v7, %v826_v63 }
 0x260   : > { %v1423_v11 = vpop.eup %1422  ;;  %v990_v12 = vmul.f32 %v1421_v34, %v2144_v6 }
 0x261   : > { %v1425_v33 = vpop.eup %1424  ;;  %v975_v15 = vadd.f32 %v1423_v11, %v1421_v34  ;;  %v991_v21 = vmul.f32 %v1423_v11, %v2141_v1  ;;  %v857_v22 = vadd.f32 %v856_v29, %v855_v24  ;;  %v944_v1 = vsub.f32 %v2133_v0, %v2136_v5 }
 0x262   : > { %v1427_v25 = vpop.eup %1426  ;;  %v999_v28 = vsel %vm998_vm3, %v990_v12, 0.0  ;;  %v992_v4 = vmul.f32 %v1425_v33, %v2157_v14  ;;  %v829_v42 = vrot.slane %v828_v16, 2 }
 0x263   : > { %v1429_v18 = vpop.eup %1428  ;;  %v976_v30 = vadd.f32 %v1425_v33, %v975_v15  ;;  %v1000_v20 = vsel %vm998_vm3, %v991_v21, 0.0  ;;  %v993_v6 = vmul.f32 %v1427_v25, %v2153_v17  ;;  %v858_v14 = vrot.slane %v857_v22, 4 }
 0x264   : > { %v1431_v36 = vpop.eup %1430  ;;  %v1001_v23 = vadd.f32 %v1000_v20, %v999_v28  ;;  %v1002_v39 = vsel %vm998_vm3, %v992_v4, 0.0  ;;  %v994_v40 = vmul.f32 %v1429_v18, %v2165_v38  ;;  %v945_v48 = vmul.f32 1.442695, %v944_v1 }
 0x265   : > { %v977_v37 = vadd.f32 %v1427_v25, %v976_v30  ;;  %v1433_v41 = vpop.eup %1432  ;;  %v1004_v46 = vsel %vm998_vm3, %v993_v6, 0.0  ;;  %v995_v17 = vmul.f32 %v1431_v36, %v2161_v35  ;;  %v859_v26 = vadd.f32 %v858_v14, %v857_v22  ;;  %v1040_v22 = vld [vmem:[%s2252_s6] sm:$0x1] }
 0x266   : > { %v1003_v43 = vadd.f32 %v1002_v39, %v1001_v23  ;;  %v1435_v47 = vpop.eup %1434  ;;  %v1006_v5 = vsel %vm998_vm3, %v994_v40, 0.0  ;;  %v996_v51 = vmul.f32 %v1433_v41, %v724_v32  ;;  %v830_v19 = vadd.f32 %v829_v42, %v828_v16 }
 0x267   : > { %v978_v44 = vadd.f32 %v1429_v18, %v977_v37  ;;  %v860_v50 = vrot.slane %v859_v26, 2  ;;  %v1437_v54 = vpop.eup %1436  ;;  %v1008_v27 = vsel %vm998_vm3, %v995_v17, 0.0  ;;  %v997_v31 = vmul.f32 %v1435_v47, %v729_v56 }
 0x268   : > { %v1005_v49 = vadd.f32 %v1004_v46, %v1003_v43  ;;  %1438 = vpow2.f32 %v945_v48  ;;  %v1010_v55 = vsel %vm998_vm3, %v996_v51, 0.0  ;;  %v834_v59 = vmul.f32 %v1437_v54, %v2005_v45 }
 0x269   : > { %v979_v0 = vadd.f32 %v1431_v36, %v978_v44  ;;  %v861_v53 = vadd.f32 %v860_v50, %v859_v26  ;;  %v831_v62 = vrot.slane %v830_v19, 1  ;;  %v1012_v32 = vsel %vm998_vm3, %v997_v31, 0.0 }
 0x26a   : > { %v1007_v38 = vadd.f32 %v1006_v5, %v1005_v49 }
 0x26b   : > { %v980_v52 = vadd.f32 %v1433_v41, %v979_v0  ;;  %v862_v58 = vrot.slane %v861_v53, 1  ;;  %v832_v56 = vadd.f32 %v831_v62, %v830_v19 }
 0x26c   : > { %v1009_v57 = vadd.f32 %v1008_v27, %v1007_v38 }
 0x26d   : > { %v981_v35 = vadd.f32 %v1435_v47, %v980_v52  ;;  %v863_v60 = vadd.f32 %v862_v58, %v861_v53  ;;  %v833_v12 = vadd.f32 %v1437_v54, %v832_v56 }
 0x26e   : > { %v1011_v61 = vadd.f32 %v1010_v55, %v1009_v57 }
 0x26f   : > { %v982_v63 = vrot.slane %v981_v35, 4  ;;  %v864_v7 = vadd.f32 %v863_v60, %v834_v59  ;;  %1440 = vrcp.f32 %v833_v12 }
 0x270   : > { %v1013_v2 = vadd.f32 %v1012_v32, %v1011_v61 }
 0x271   : > { %v983_v3 = vadd.f32 %v982_v63, %v981_v35 }
 0x272   : > { %v1014_v8 = vrot.slane %v1013_v2, 4 }
 0x273   : > { %v984_v9 = vrot.slane %v983_v3, 2 }
 0x274   : > { %v1015_v34 = vadd.f32 %v1014_v8, %v1013_v2 }
 0x275   : > { %v985_v10 = vadd.f32 %v984_v9, %v983_v3  ;;  %v1439_v15 = vpop.eup %1438 }
 0x276   : > { %v1016_v11 = vrot.slane %v1015_v34, 2  ;;  %v989_v28 = vmul.f32 %v1439_v15, %v2005_v45 }
 0x277   : > { %v986_v13 = vrot.slane %v985_v10, 1 }
 0x278   : > { %v1017_v33 = vadd.f32 %v1016_v11, %v1015_v34 }
 0x279   : > { %v987_v21 = vadd.f32 %v986_v13, %v985_v10 }
 0x27a   : > { %v1018_v24 = vrot.slane %v1017_v33, 1 }
 0x27b   : > { %v988_v25 = vadd.f32 %v1439_v15, %v987_v21 }
 0x27c   : > { %v1019_v16 = vadd.f32 %v1018_v24, %v1017_v33  ;;  %v1441_v29 = vpop.eup %1440 }
 0x27d   : > { %1442 = vrcp.f32 %v988_v25  ;;  %v866_v30 = vmul.f32 %v1441_v29, %v864_v7 }
 0x27e   : > { %v1020_v4 = vadd.f32 %v1019_v16, %v989_v28 }
 0x28a   : > { %v1443_v18 = vpop.eup %1442 }
 0x28b   : > { %v1022_v20 = vmul.f32 %v1443_v18, %v1020_v4 }
 0x28d   : > { %v1023_v6 = vsel %vm750_vm1, %v866_v30, %v1022_v20 }
 0x28e   : > { %1360 = vmatmul.mubr.f32.vlgmr.msra.gmra.mxu0 %v1023_v6 }
 0x34e   : > { %v1107_v36 = vpop.f32.mrf.mxu0 }
 0x34f   : > { %v1108_v45 = vadd.f32 %v1107_v36, %v1040_v22 }
 0x350   : > { %v1361_v1 = vpop.f32.mrf.mxu0 }
 0x351   : > { %1111 = vst [vmem:[%s270_s19] sm:$0x1] %v1108_v45 }
 0x352   : > { %1457 = shalt.err (!%p1454_p3)
}
 0x353   : > { %s1458_s14 = scalar_lea.hbm %s2211_s22, 16  ;;  %s1462_s17 = scalar_lea.hbm %s2253_s7, 32 }
 0x354   : > { %p1459_p4 = scmp.ne.s32.totalorder %s2211_s22, %s1458_s14  ;;  %p1463_p9 = scmp.lt.s32.totalorder %s2211_s22, %s2253_s7 }
 0x355   : > { %p1464_p10 = scmp.lt.s32.totalorder %s1462_s17, %s1458_s14 }
 0x356   : > { %p1460_p7 = pnand %p1459_p4, %p1588_p5 }
 0x357   : > { %p1465_p11 = por %p1464_p10, %p1463_p9 }
 0x358   : > { %p1461_p8 = pneg %p1460_p7 }
 0x35a   : > { %p1466_p12 = pnand %p1465_p11, %p1461_p8 }
 0x35c   : > { %1469 = shalt.err (!%p1466_p12)
}
 0x35d   : > { %1362 = dma.vmem_to_hbm [thread:$0]  (%p1588_p5), %s1126_s23, 16, %s2211_s22, %s1113_s29  }
 0x35e PF: > { %p1368_p13 = scmp.ge.s32.totalorder %s1504_s27, 2  ;;  %s1137_s20 = sand.u32 1, %s1492_s24  }
 0x35f   : > { %s1138_s21 = scalar_lea.sflag [#allocation3], %s1137_s20 }
 0x360   : > { %p1365_p0 = pnand %p1368_p13, %p1592_p6 }
 0x362   : > { %p1366_p1 = pneg %p1365_p0 }
 0x364   : > { %1487 = dma.done.wait (%p1366_p1), %s1138_s21, 16  }
 0x365   : > { %1489 = vsyncadd (%p1366_p1), %s1138_s21, 4294967280  ;;  %p17_p2 = scmp.ge.s32.totalorder %s1575_s30, 4   ;;  %s2256_s24 = smov %s1496_s25 }
 0x366   : > { %s2257_s25 = smov %s1500_s26  ;;  %s2258_s26 = smov %s1586_s10 }
 0x367   : > { %s2259_s27 = smov %s1575_s30  ;;  %19 = sbr.rel (!%p17_p2) target bundleno = 3 (0x3), region = 83 }
 0x36c   :  { %1142 = vsyncpa [#allocation3], 1 }
 0x36d   :  { %1144 = vsyncpa [#allocation3 + $0x1], 1 }

</bundles_post_ra>
